<compile_context>
chip_gen: v5e
topology: v5e:2x2
jax: 0.10.0
libtpu: 0.0.40
codegen_flags: <defaults>
</compile_context>

<pallas_src>
import jax
import jax.numpy as jnp
from jax.experimental import pallas as pl
from jax.experimental.pallas import tpu as pltpu


def _relu_linear_kernel(x_ref, w_ref, b_ref, o_ref):
    # out = ReLU(x @ W + b). Used by both the packed (128-lane, block-diagonal W)
    # fast path and the narrow fallback path.
    y = jnp.dot(x_ref[...], w_ref[...], preferred_element_type=jnp.float32) + b_ref[...]
    o_ref[...] = jnp.maximum(y, 0.0).astype(o_ref.dtype)


def _highway_gate_kernel(x_ref, w1_ref, b1_ref, w2_ref, b2_ref, o_ref):
    # Faithful path: proj = ReLU(linear1(x)), gate = softmax(linear2(x), axis=-1),
    # out = proj * gate + (1 - gate) * proj   (algebraically == proj).
    x = x_ref[...]
    proj = jnp.maximum(
        jnp.dot(x, w1_ref[...], preferred_element_type=jnp.float32) + b1_ref[...], 0.0)
    z = jnp.dot(x, w2_ref[...], preferred_element_type=jnp.float32) + b2_ref[...]
    z = z - jnp.max(z, axis=-1, keepdims=True)
    e = jnp.exp(z)
    gate = e * pl.reciprocal(jnp.sum(e, axis=-1, keepdims=True), approx=True)  # EUP slot
    out = proj * gate + (1.0 - gate) * proj
    o_ref[...] = out.astype(o_ref.dtype)


def _vmem_limit_bytes(per_step_bytes):
    # Generation-aware cap: never request more than ~3/4 of physical VMEM
    # (v7x: 64 MiB physical -> 48 MiB cap; v5e/v6e: 128 MiB -> 96 MiB cap).
    phys = 64 * 1024 * 1024  # conservative fallback (v7x)
    try:
        phys = int(pltpu.get_tpu_info().vmem_capacity_bytes)
    except Exception:
        pass
    cap = phys * 3 // 4
    return int(min(cap, max(4 * per_step_bytes, 32 * 1024 * 1024)))


def highway_forward(x, w1, b1, w2, b2, *, with_gate=False, tm_max=2048):
    """x: (B, S, E).  w1/w2: (E, E) in PyTorch (out, in) layout.  b1/b2: (E,)."""
    B, S, E = x.shape
    R = B * S
    dtype = x.dtype
    x2d = x.reshape(R, E)  # free (contiguous) reshape

    def _params(vmem):
        return pltpu.CompilerParams(
            dimension_semantics=("parallel",), vmem_limit_bytes=vmem)

    # ---- Fast path: pack rows so every load/store is lane-dense (128 wide) ----
    pack = 128 // E if (E <= 128 and 128 % E == 0) else 1
    if (not with_gate) and pack > 1 and R % pack == 0:
        Rp, Np = R // pack, pack * E
        xp = x2d.reshape(Rp, Np)                                  # free reshape
        w_bd = jnp.kron(jnp.eye(pack, dtype=dtype), w1.T.astype(dtype))  # (Np, Np)
        b_t = jnp.tile(b1.astype(dtype), pack).reshape(1, Np)
        TM = Rp if Rp <= tm_max else tm_max                       # full dim or mult of 8
        grid = (pl.cdiv(Rp, TM),)

        per_step = 4 * (4 * TM * Np + 2 * (Np * Np + Np))  # dbl-buffered x/out + weights
        cost = pl.CostEstimate(
            flops=int(2 * Rp * Np * Np + 2 * Rp * Np),
            transcendentals=0,
            bytes_accessed=int(4 * (2 * Rp * Np + Np * Np + Np)),
        )
        out = pl.pallas_call(
            _relu_linear_kernel,
            out_shape=jax.ShapeDtypeStruct((Rp, Np), dtype),
            grid=grid,
            in_specs=[
                pl.BlockSpec((TM, Np), lambda i: (i, 0)),   # x: pipelined row tiles
                pl.BlockSpec((Np, Np), lambda i: (0, 0)),   # block-diag W: resident
                pl.BlockSpec((1, Np), lambda i: (0, 0)),    # tiled bias: resident
            ],
            out_specs=pl.BlockSpec((TM, Np), lambda i: (i, 0)),
            compiler_params=_params(_vmem_limit_bytes(per_step)),
            cost_estimate=cost,
        )(xp, w_bd, b_t)
        return out.reshape(B, S, E)

    # ---- Narrow path (gate path, or shapes unsuited to packing) ----
    # Output is (R, E) directly: E equals the full array dim, so (TM, E) is a
    # legal block. No lane padding, no wrapper pad/slice, no x copy.
    TM = R if R <= tm_max else tm_max
    grid = (pl.cdiv(R, TM),)
    w1t = w1.T.astype(dtype)
    b1r = b1.reshape(1, E).astype(dtype)
    x_spec = pl.BlockSpec((TM, E), lambda i: (i, 0))
    w_spec = pl.BlockSpec((E, E), lambda i: (0, 0))
    b_spec = pl.BlockSpec((1, E), lambda i: (0, 0))

    if with_gate:
        w2t = w2.T.astype(dtype)
        b2r = b2.reshape(1, E).astype(dtype)
        kernel = _highway_gate_kernel
        inputs = (x2d, w1t, b1r, w2t, b2r)
        in_specs = [x_spec, w_spec, b_spec, w_spec, b_spec]
        n_w = 2
    else:
        kernel = _relu_linear_kernel
        inputs = (x2d, w1t, b1r)
        in_specs = [x_spec, w_spec, b_spec]
        n_w = 1

    per_step = 4 * (4 * TM * E + 2 * n_w * (E * E + E))
    cost = pl.CostEstimate(
        flops=int(2 * R * E * E * n_w + 8 * R * E),
        transcendentals=int(R * E) if with_gate else 0,
        bytes_accessed=int(4 * (2 * R * E + n_w * (E * E + E))),
    )
    out2d = pl.pallas_call(
        kernel,
        out_shape=jax.ShapeDtypeStruct((R, E), dtype),
        grid=grid,
        in_specs=in_specs,
        out_specs=x_spec,
        compiler_params=_params(_vmem_limit_bytes(per_step)),
        cost_estimate=cost,
    )(*inputs)
    return out2d.reshape(B, S, E)


def highway_reference(x, w1, b1, w2, b2):
    proj = jax.nn.relu(jnp.einsum("bse,oe->bso", x, w1) + b1)
    gate = jax.nn.softmax(jnp.einsum("bse,oe->bso", x, w2) + b2, axis=2)
    return proj * gate + (1.0 - gate) * proj


if __name__ == "__main__":
    B, S, E = 2, 8, 32  # batch, seq, embed_size
    key = jax.random.PRNGKey(0)
    kx, k1, k2, k3, k4 = jax.random.split(key, 5)

    x = jax.random.normal(kx, (B, S, E), dtype=jnp.float32)

    # Deterministic nn.Linear-style init: U(-1/sqrt(fan_in), 1/sqrt(fan_in))
    bound = 1.0 / jnp.sqrt(jnp.float32(E))
    w1 = jax.random.uniform(k1, (E, E), jnp.float32, -bound, bound)
    b1 = jax.random.uniform(k2, (E,), jnp.float32, -bound, bound)
    w2 = jax.random.uniform(k3, (E, E), jnp.float32, -bound, bound)
    b2 = jax.random.uniform(k4, (E,), jnp.float32, -bound, bound)

    ref = highway_reference(x, w1, b1, w2, b2)

    # Fast path: 4 rows packed per 128-lane row, block-diagonal weight, lane-dense I/O.
    out = highway_forward(x, w1, b1, w2, b2)
    jax.block_until_ready(out)
    assert out.shape == (B, S, E)
    assert jnp.allclose(out, ref, atol=1e-5, rtol=1e-5), "mismatch vs reference (fast path)"

    # Faithful path: exact E-wide softmax gate + highway blend (== x_proj by algebra).
    out_gate = highway_forward(x, w1, b1, w2, b2, with_gate=True)
    jax.block_until_ready(out_gate)
    assert jnp.allclose(out_gate, ref, atol=1e-5, rtol=1e-5), "mismatch vs reference (gate path)"

    print("KERNEL_OK")
</pallas_src>

<mosaic_0001>
module attributes {stable_mosaic.version = 11 : i64} {
  func.func @_relu_linear_kernel(%arg0: i32, %arg1: memref<4x128xf32, #tpu.memory_space<vmem>>, %arg2: memref<128x128xf32, #tpu.memory_space<vmem>>, %arg3: memref<1x128xf32, #tpu.memory_space<vmem>>, %arg4: memref<4x128xf32, #tpu.memory_space<vmem>>) attributes {dimension_semantics = [#tpu.dimension_semantics<parallel>], iteration_bounds = array<i64: 1>, scalar_prefetch = 0 : i64, scratch_operands = 0 : i64, tpu.core_type = #tpu.core_type<tc>, window_params = [{transform_indices = @transform_0, window_bounds = array<i64: 4, 128>}, {pipeline_mode = #tpu.pipeline_mode<synchronous>, transform_indices = @transform_1, window_bounds = array<i64: 128, 128>}, {pipeline_mode = #tpu.pipeline_mode<synchronous>, transform_indices = @transform_2, window_bounds = array<i64: 1, 128>}, {transform_indices = @transform_3, window_bounds = array<i64: 4, 128>}]} {
    %c0 = arith.constant 0 : index
    %c0_0 = arith.constant 0 : index
    %0 = vector.load %arg1[%c0, %c0_0] : memref<4x128xf32, #tpu.memory_space<vmem>>, vector<4x128xf32>
    %c0_1 = arith.constant 0 : index
    %c0_2 = arith.constant 0 : index
    %1 = vector.load %arg2[%c0_1, %c0_2] : memref<128x128xf32, #tpu.memory_space<vmem>>, vector<128x128xf32>
    %cst = arith.constant dense<0.000000e+00> : vector<4x128xf32>
    %2 = tpu.matmul %0, %1, %cst {dimension_numbers = #tpu.dot_dimension_numbers<[1], [0], [0], [1], [0, 0, 1, 1], [], []>} : vector<4x128xf32>, vector<128x128xf32>, vector<4x128xf32> -> vector<4x128xf32>
    %c0_3 = arith.constant 0 : index
    %c0_4 = arith.constant 0 : index
    %3 = vector.load %arg3[%c0_3, %c0_4] : memref<1x128xf32, #tpu.memory_space<vmem>>, vector<1x128xf32>
    %4 = vector.broadcast %3 : vector<1x128xf32> to vector<4x128xf32>
    %5 = arith.addf %2, %4 : vector<4x128xf32>
    %cst_5 = arith.constant 0.000000e+00 : f32
    %6 = vector.broadcast %cst_5 : f32 to vector<4x128xf32>
    %7 = arith.maximumf %5, %6 : vector<4x128xf32>
    %c0_6 = arith.constant 0 : index
    %c0_7 = arith.constant 0 : index
    %8 = vector.load %arg4[%c0_6, %c0_7] : memref<4x128xf32, #tpu.memory_space<vmem>>, vector<4x128xf32>
    tpu.vector_store %arg4[%c0_6, %c0_7], %7 {strides = array<i32>} : memref<4x128xf32, #tpu.memory_space<vmem>>, vector<4x128xf32>,
    return
  }
  func.func @transform_0(%arg0: i32) -> (i32, i32) {
    %c0_i32 = arith.constant 0 : i32
    %c0_i32_0 = arith.constant 0 : i32
    return %arg0, %c0_i32 : i32, i32
  }
  func.func @transform_1(%arg0: i32) -> (i32, i32) {
    %c0_i32 = arith.constant 0 : i32
    %c0_i32_0 = arith.constant 0 : i32
    %c0_i32_1 = arith.constant 0 : i32
    return %c0_i32, %c0_i32_0 : i32, i32
  }
  func.func @transform_2(%arg0: i32) -> (i32, i32) {
    %c0_i32 = arith.constant 0 : i32
    %c0_i32_0 = arith.constant 0 : i32
    %c0_i32_1 = arith.constant 0 : i32
    return %c0_i32, %c0_i32_0 : i32, i32
  }
  func.func @transform_3(%arg0: i32) -> (i32, i32) {
    %c0_i32 = arith.constant 0 : i32
    %c0_i32_0 = arith.constant 0 : i32
    return %arg0, %c0_i32 : i32, i32
  }
}

</mosaic_0001>

<bundles_post_ra>
// kernel: tpu_custom_call.1
= control target key start
LH: loop header
LB: loop body
LE: loop exit
PB: predicated region body
PF: predicated region fallthrough
CT: control target
= control target key end

     0   :  { %8 = vsyncpa [#allocation3], 0  ;;  %s227_s0 = inlined_call_operand.hbm [shape: f32[4,128], index: 0, kind: input, shape index: {}]   ;;  %s228_s1 = inlined_call_operand.hbm [shape: f32[128,128], index: 1, kind: input, shape index: {}]   ;;  %s229_s2 = inlined_call_operand.vmem [shape: f32[1,128], index: 2, kind: input, shape index: {}]   ;;  %s230_s3 = inlined_call_operand.hbm [shape: f32[4,128], index: 3, kind: output, shape index: {}]  }
   0x1   :  { %9 = vsyncpa [#allocation6], 0 }
   0x2   :  { %10 = vsyncpa [#allocation4], 0  ;;  %s16_s14 = sshll.u32 %s227_s0, 4  ;;  %s190_s15 = smov [#allocation2]   ;;  %s17_s14 = int_to_ptr.hbm [resolvable:$true] %s16_s14 }
   0x3   :  { %s18_s16 = sshll.u32 %s190_s15, 4  ;;  %s26_s19 = sshll.u32 %s228_s1, 4  ;;  %s19_s16 = int_to_ptr.vmem [resolvable:$true] %s18_s16  ;;  %s27_s19 = int_to_ptr.hbm [resolvable:$true] %s26_s19 }
   0x4   :  { %21 = dma.hbm_to_vmem [thread:$0]  %s17_s14, 64, %s19_s16, [#allocation3]  }
   0x5   :  { %s191_s20 = smov [#allocation5]   ;;  %s192_s22 = smov 128  }
   0x6   :  { %s28_s21 = sshll.u32 %s191_s20, 4  ;;  %s193_s23 = smov 8   ;;  %s29_s21 = int_to_ptr.vmem [resolvable:$true] %s28_s21 }
   0x7   :  { %34 = dma.hbm_to_vmem [thread:$0]  %s27_s19, 2048, %s29_s21, [#allocation6], %s192_s22, %s192_s22, %s193_s23  }
   0x8   :  { %184 = dma.done.wait [#allocation3], 64  }
   0x9   :  { %185 = vsyncadd [#allocation3], 4294967232 }
   0xa   :  { %186 = dma.done.wait [#allocation6], 2048  }
   0xb   :  { %187 = vsyncadd [#allocation6], 4294965248  ;;  %v61_v0 = vld [vmem:[#allocation5 + $0x78] sm:$0xff]  ;;  %v60_v1 = vld [vmem:[#allocation5 + $0x70] sm:$0xff]  ;;  %s194_s24 = smov [#allocation7]   ;;  %s95_s28 = sshll.u32 %s230_s3, 4  ;;  %s96_s28 = int_to_ptr.hbm [resolvable:$true] %s95_s28 }
   0xc   :  { %66 = vmatpush.msra.mxu0 %v61_v0  ;;  %v59_v2 = vld [vmem:[#allocation5 + $0x68] sm:$0xff]  ;;  %v58_v3 = vld [vmem:[#allocation5 + $0x60] sm:$0xff]  ;;  %v57_v4 = vld [vmem:[#allocation5 + $0x58] sm:$0xff]  ;;  %s93_s25 = sshll.u32 %s194_s24, 4  ;;  %s94_s25 = int_to_ptr.vmem [resolvable:$true] %s93_s25 }
   0xd   :  { %v56_v5 = vld [vmem:[#allocation5 + $0x50] sm:$0xff]  ;;  %v55_v6 = vld [vmem:[#allocation5 + $0x48] sm:$0xff]  ;;  %v54_v7 = vld [vmem:[#allocation5 + $0x40] sm:$0xff] }
   0xe   :  { %67 = vmatpush.msra.mxu0 %v60_v1  ;;  %v53_v8 = vld [vmem:[#allocation5 + $0x38] sm:$0xff]  ;;  %v52_v9 = vld [vmem:[#allocation5 + $0x30] sm:$0xff]  ;;  %v51_v10 = vld [vmem:[#allocation5 + $0x28] sm:$0xff] }
   0xf   :  { %v50_v11 = vld [vmem:[#allocation5 + $0x20] sm:$0xff]  ;;  %v49_v12 = vld [vmem:[#allocation5 + $0x18] sm:$0xff]  ;;  %v48_v13 = vld [vmem:[#allocation5 + $0x10] sm:$0xff] }
  0x10   :  { %68 = vmatpush.msra.mxu0 %v59_v2  ;;  %v47_v14 = vld [vmem:[#allocation5 + $0x8] sm:$0xff]  ;;  %v46_v15 = vld [vmem:[#allocation5] sm:$0xff]  ;;  %v45_v16 = vld [vmem:[#allocation2] sm:$0xf] }
  0x11   :  { %v111_v17 = vld [vmem:[%s229_s2] ss:$0 sm:$0xff] }
  0x12   :  { %69 = vmatpush.msra.mxu0 %v58_v3 }
  0x14   :  { %70 = vmatpush.msra.mxu0 %v57_v4 }
  0x16   :  { %71 = vmatpush.msra.mxu0 %v56_v5 }
  0x18   :  { %72 = vmatpush.msra.mxu0 %v55_v6 }
  0x1a   :  { %73 = vmatpush.msra.mxu0 %v54_v7 }
  0x1c   :  { %74 = vmatpush.msra.mxu0 %v53_v8 }
  0x1e   :  { %75 = vmatpush.msra.mxu0 %v52_v9 }
  0x20   :  { %76 = vmatpush.msra.mxu0 %v51_v10 }
  0x22   :  { %77 = vmatpush.msra.mxu0 %v50_v11 }
  0x24   :  { %78 = vmatpush.msra.mxu0 %v49_v12 }
  0x26   :  { %79 = vmatpush.msra.mxu0 %v48_v13 }
  0x28   :  { %80 = vmatpush.msra.mxu0 %v47_v14 }
  0x2a   :  { %81 = vmatpush.msra.mxu0 %v46_v15 }
  0x2b   :  { %82 = vmatmul.f32.vlgmr.msra.gmra.mxu0 %v45_v16 }
  0xa8   :  { %v83_v18 = vpop.f32.mrf.mxu0 }
  0xa9   :  { %v84_v19 = vadd.f32 %v111_v17, %v83_v18 }
  0xab   :  { %v86_v20 = vmax.f32 %v84_v19, 0.0 }
  0xad   :  { %87 = vst [vmem:[#allocation7] sm:$0xf] %v86_v20 }
  0xae   :  { %98 = dma.vmem_to_hbm [thread:$0]  %s94_s25, 64, %s96_s28, [#allocation4]  }
  0xaf   :  { %188 = dma.done.wait [#allocation4], 64  }
  0xb0   :  { %189 = vsyncadd [#allocation4], 4294967232 }
  0xb1   :  { %103 = vsyncpa [#allocation3], 1 }
  0xb2   :  { %104 = vsyncpa [#allocation6], 1 }
  0xb3   :  { %105 = vsyncpa [#allocation4], 1 }

</bundles_post_ra>
